<compile_context>
chip_gen: v7x
topology: tpu7x:2x2x1
jax: 0.10.0
libtpu: 0.0.40
codegen_flags: <defaults>
</compile_context>

<pallas_src>
import functools

import jax
import jax.numpy as jnp
import numpy as np
from jax.experimental import pallas as pl
from jax.experimental.pallas import tpu as pltpu


def _mha_head_kernel(x_ref, wq_ref, bq_ref, wk_ref, bk_ref, wv_ref, bv_ref,
                     wp_ref, bp_ref, out_ref, acc_ref, *, scaling, n_valid):
    h = pl.program_id(1)
    num_heads = pl.num_programs(1)

    x = x_ref[0]                       # (Np, E), native dtype
    cdt = x.dtype                      # MXU compute dtype (bf16 stays bf16)
    n_pad = x.shape[0]

    @pl.when(h == 0)
    def _init():
        acc_ref[...] = jnp.zeros_like(acc_ref)

    def proj(w_ref, b_ref):            # x @ W_h + b_h, f32 accumulation
        y = jnp.dot(x, w_ref[0], preferred_element_type=jnp.float32)
        return (y + b_ref[0].astype(jnp.float32)).astype(cdt)

    q = proj(wq_ref, bq_ref)           # (Np, D)
    k = proj(wk_ref, bk_ref)           # (Np, D)
    v = proj(wv_ref, bv_ref)           # (Np, D)

    # energy[i, j] = <q_i, k_j>  -- contraction over D, no physical k.T.
    energy = jax.lax.dot_general(
        q, k, (((1,), (1,)), ((), ())),
        preferred_element_type=jnp.float32)                  # (Np, Np) f32

    if n_valid < n_pad:                # static at trace time
        kidx = jax.lax.broadcasted_iota(jnp.int32, energy.shape, 1)
        energy = jnp.where(kidx < n_valid, energy,
                           jnp.finfo(jnp.float32).min)

    # softmax over keys, THEN * scaling (reference order); scaling folded into
    # the EUP approximate reciprocal of the denominator.
    m = jnp.max(energy, axis=-1, keepdims=True)
    p = jnp.exp(energy - m)
    denom = jnp.sum(p, axis=-1, keepdims=True)
    att = p * (pl.reciprocal(denom, approx=True) * scaling)
    # dropout p=0.0 -> identity

    ctx = jnp.dot(att.astype(cdt), v,
                  preferred_element_type=jnp.float32)         # (Np, D) f32

    # Fused output projection, accumulated over the head grid axis:
    #   out += ctx_h @ Wp[h*D:(h+1)*D, :]
    acc_ref[...] += jnp.dot(ctx.astype(cdt), wp_ref[0],
                            preferred_element_type=jnp.float32)

    @pl.when(h == num_heads - 1)
    def _finalize():
        out = acc_ref[...] + bp_ref[...].astype(jnp.float32)
        out_ref[0] = out.astype(out_ref.dtype)


def prepare_mha_params(wq, bq, wk, bk, wv, bv, wp, bp, *, num_heads):
    """One-time (init-time) relayout of nn.Linear params to head-major blocks.

    Inputs use the (in, out) convention: y = x @ W + b.
    """
    E = wq.shape[0]
    D = E // num_heads

    def heads_out(w):                  # (E, E) -> (H, E, D): per-head columns
        return w.reshape(E, num_heads, D).transpose(1, 0, 2)

    def heads_bias(b):                 # (1, E) -> (H, 1, D)
        return b.reshape(1, num_heads, D).transpose(1, 0, 2)

    return dict(
        wq=heads_out(wq), bq=heads_bias(bq),
        wk=heads_out(wk), bk=heads_bias(bk),
        wv=heads_out(wv), bv=heads_bias(bv),
        wp=wp.reshape(num_heads, D, E),   # per-head input rows of projection
        bp=bp.reshape(1, E),
        num_heads=num_heads,
    )


def multi_head_attention(x, params):
    B, N, E = x.shape
    H = params["num_heads"]
    D = E // H
    scaling = float(D) ** -0.5

    # Pad sequence to a lane-dense length (padded keys masked in the kernel,
    # padded query rows sliced off below).  e.g. ViT N=197 -> 256.
    lane = 128 if N >= 64 else 8
    n_pad = ((N + lane - 1) // lane) * lane
    x_in = jnp.pad(x, ((0, 0), (0, n_pad - N), (0, 0))) if n_pad != N else x

    kernel = functools.partial(_mha_head_kernel, scaling=scaling, n_valid=N)

    # --- VMEM budget & cost estimate -----------------------------------------
    itemsize = x.dtype.itemsize
    w_itemsize = jnp.dtype(params["wq"].dtype).itemsize
    per_head_w = (3 * E * D + 3 * D + D * E + E) * w_itemsize
    working = (2 * 2 * n_pad * E * itemsize     # x + out, double-buffered
               + 2 * per_head_w                 # per-head weights, dbl-buffered
               + n_pad * E * 4                  # f32 accumulator scratch
               + 3 * n_pad * n_pad * 4          # energy / exp / att
               + 6 * n_pad * D * 4)             # q, k, v (+ headroom)
    vmem_limit = int(min(max(2 * working, 32 * 2 ** 20), 64 * 2 ** 20))

    flops = 2 * B * H * (3 * n_pad * E * D      # q/k/v projections
                         + 2 * n_pad * n_pad * D  # scores + att @ v
                         + n_pad * D * E)       # output projection
    bytes_accessed = (B * 2 * n_pad * E * itemsize + B * H * per_head_w
                      + E * w_itemsize)
    cost = pl.CostEstimate(flops=flops,
                           transcendentals=B * H * n_pad * n_pad,
                           bytes_accessed=bytes_accessed)

    out = pl.pallas_call(
        kernel,
        out_shape=jax.ShapeDtypeStruct((B, n_pad, E), x.dtype),
        grid_spec=pltpu.PrefetchScalarGridSpec(
            num_scalar_prefetch=0,
            grid=(B, H),                         # head axis = reduction, last
            in_specs=[
                pl.BlockSpec((1, n_pad, E), lambda b, h: (b, 0, 0)),   # x
                pl.BlockSpec((1, E, D), lambda b, h: (h, 0, 0)),       # Wq[h]
                pl.BlockSpec((1, 1, D), lambda b, h: (h, 0, 0)),       # bq[h]
                pl.BlockSpec((1, E, D), lambda b, h: (h, 0, 0)),       # Wk[h]
                pl.BlockSpec((1, 1, D), lambda b, h: (h, 0, 0)),       # bk[h]
                pl.BlockSpec((1, E, D), lambda b, h: (h, 0, 0)),       # Wv[h]
                pl.BlockSpec((1, 1, D), lambda b, h: (h, 0, 0)),       # bv[h]
                pl.BlockSpec((1, D, E), lambda b, h: (h, 0, 0)),       # Wp[h]
                pl.BlockSpec((1, E), lambda b, h: (0, 0)),             # bp
            ],
            out_specs=pl.BlockSpec((1, n_pad, E), lambda b, h: (b, 0, 0)),
            scratch_shapes=[pltpu.VMEM((n_pad, E), jnp.float32)],
        ),
        compiler_params=pltpu.CompilerParams(
            dimension_semantics=("parallel", "arbitrary"),
            vmem_limit_bytes=vmem_limit),
        cost_estimate=cost,
    )(x_in, params["wq"], params["bq"], params["wk"], params["bk"],
      params["wv"], params["bv"], params["wp"], params["bp"])

    return out[:, :N, :] if n_pad != N else out


def _reference(x, wq, bq, wk, bk, wv, bv, wp, bp, num_heads):
    """Pure-JAX reference mirroring the PyTorch forward exactly."""
    B, N, E = x.shape
    D = E // num_heads
    scaling = float(D) ** -0.5

    def split_heads(t):  # b n (h d) -> b h n d
        return t.reshape(B, N, num_heads, D).transpose(0, 2, 1, 3)

    q = split_heads(x @ wq + bq)
    k = split_heads(x @ wk + bk)
    v = split_heads(x @ wv + bv)
    energy = jnp.einsum('bhqd,bhkd->bhqk', q, k)
    att = jax.nn.softmax(energy, axis=-1) * scaling
    out = jnp.einsum('bhal,bhlv->bhav', att, v)
    out = out.transpose(0, 2, 1, 3).reshape(B, N, E)
    return out @ wp + bp


def _make_params(key, E):
    """Deterministic nn.Linear-like params stored as (in, out)."""
    keys = jax.random.split(key, 8)
    scale = 1.0 / np.sqrt(E)
    u = lambda k, shape: jax.random.uniform(k, shape, jnp.float32, -scale, scale)
    return dict(wq=u(keys[0], (E, E)), wk=u(keys[1], (E, E)),
                wv=u(keys[2], (E, E)), wp=u(keys[3], (E, E)),
                bq=u(keys[4], (1, E)), bk=u(keys[5], (1, E)),
                bv=u(keys[6], (1, E)), bp=u(keys[7], (1, E)))


def _check(x, raw, num_heads, rtol=2e-3, atol=2e-3):
    params = prepare_mha_params(raw["wq"], raw["bq"], raw["wk"], raw["bk"],
                                raw["wv"], raw["bv"], raw["wp"], raw["bp"],
                                num_heads=num_heads)
    out = jax.block_until_ready(multi_head_attention(x, params))
    ref = _reference(x, raw["wq"], raw["bq"][0], raw["wk"], raw["bk"][0],
                     raw["wv"], raw["bv"][0], raw["wp"], raw["bp"][0], num_heads)
    # Tolerance accounts for the EUP approximate reciprocal in the softmax
    # denominator (~1e-4 rel) and bf16-pass f32 MXU accumulation.
    np.testing.assert_allclose(np.asarray(out), np.asarray(ref),
                               rtol=rtol, atol=atol)


if __name__ == "__main__":
    key = jax.random.PRNGKey(0)
    k_x1, k_x2, k_p = jax.random.split(key, 3)

    # Primary small case (no padding path): B=2, N=8, E=32, H=4.
    B, N, E, H = 2, 8, 32, 4
    raw = _make_params(k_p, E)
    x = jax.random.normal(k_x1, (B, N, E), dtype=jnp.float32)
    _check(x, raw, H)

    # Second case exercising the lane-padding + key-mask path (N=77 -> 128).
    x2 = jax.random.normal(k_x2, (1, 77, E), dtype=jnp.float32)
    _check(x2, raw, H)

    print("KERNEL_OK")
</pallas_src>

<mosaic_0001>
module attributes {stable_mosaic.version = 11 : i64} {
  func.func @_mha_head_kernel(%arg0: i32, %arg1: i32, %arg2: memref<1x8x32xf32, #tpu.memory_space<vmem>>, %arg3: memref<1x32x8xf32, #tpu.memory_space<vmem>>, %arg4: memref<1x1x8xf32, #tpu.memory_space<vmem>>, %arg5: memref<1x32x8xf32, #tpu.memory_space<vmem>>, %arg6: memref<1x1x8xf32, #tpu.memory_space<vmem>>, %arg7: memref<1x32x8xf32, #tpu.memory_space<vmem>>, %arg8: memref<1x1x8xf32, #tpu.memory_space<vmem>>, %arg9: memref<1x8x32xf32, #tpu.memory_space<vmem>>, %arg10: memref<1x32xf32, #tpu.memory_space<vmem>>, %arg11: memref<1x8x32xf32, #tpu.memory_space<vmem>>, %arg12: memref<8x32xf32, #tpu.memory_space<vmem>>) attributes {dimension_semantics = [#tpu.dimension_semantics<parallel>, #tpu.dimension_semantics<arbitrary>], iteration_bounds = array<i64: 2, 4>, scalar_prefetch = 0 : i64, scratch_operands = 1 : i64, tpu.core_type = #tpu.core_type<tc>, window_params = [{transform_indices = @transform_0, window_bounds = array<i64: 1, 8, 32>}, {transform_indices = @transform_1, window_bounds = array<i64: 1, 32, 8>}, {transform_indices = @transform_2, window_bounds = array<i64: 1, 1, 8>}, {transform_indices = @transform_3, window_bounds = array<i64: 1, 32, 8>}, {transform_indices = @transform_4, window_bounds = array<i64: 1, 1, 8>}, {transform_indices = @transform_5, window_bounds = array<i64: 1, 32, 8>}, {transform_indices = @transform_6, window_bounds = array<i64: 1, 1, 8>}, {transform_indices = @transform_7, window_bounds = array<i64: 1, 8, 32>}, {pipeline_mode = #tpu.pipeline_mode<synchronous>, transform_indices = @transform_8, window_bounds = array<i64: 1, 32>}, {transform_indices = @transform_9, window_bounds = array<i64: 1, 8, 32>}]} {
    %c0 = arith.constant 0 : index
    %c0_0 = arith.constant 0 : index
    %c0_1 = arith.constant 0 : index
    %0 = vector.load %arg2[%c0, %c0_0, %c0_1] : memref<1x8x32xf32, #tpu.memory_space<vmem>>, vector<1x8x32xf32>
    %1 = vector.shape_cast %0 : vector<1x8x32xf32> to vector<8x32xf32>
    %c0_i32 = arith.constant 0 : i32
    %2 = arith.cmpi eq, %arg1, %c0_i32 : i32
    %3 = arith.extui %2 : i1 to i32
    %c0_i32_2 = arith.constant 0 : i32
    %4 = arith.cmpi ne, %3, %c0_i32_2 : i32
    scf.if %4 {
      %cst_37 = arith.constant 0.000000e+00 : f32
      %49 = vector.broadcast %cst_37 : f32 to vector<8x32xf32>
      %c0_38 = arith.constant 0 : index
      %c0_39 = arith.constant 0 : index
      %50 = vector.load %arg12[%c0_38, %c0_39] : memref<8x32xf32, #tpu.memory_space<vmem>>, vector<8x32xf32>
      tpu.vector_store %arg12[%c0_38, %c0_39], %49 {strides = array<i32>} : memref<8x32xf32, #tpu.memory_space<vmem>>, vector<8x32xf32>,
    } else {
    }
    %c0_3 = arith.constant 0 : index
    %c0_4 = arith.constant 0 : index
    %c0_5 = arith.constant 0 : index
    %5 = vector.load %arg3[%c0_3, %c0_4, %c0_5] : memref<1x32x8xf32, #tpu.memory_space<vmem>>, vector<1x32x8xf32>
    %6 = vector.shape_cast %5 : vector<1x32x8xf32> to vector<32x8xf32>
    %cst = arith.constant dense<0.000000e+00> : vector<8x8xf32>
    %7 = tpu.matmul %1, %6, %cst {dimension_numbers = #tpu.dot_dimension_numbers<[1], [0], [0], [1], [0, 0, 1, 1], [], []>} : vector<8x32xf32>, vector<32x8xf32>, vector<8x8xf32> -> vector<8x8xf32>
    %c0_6 = arith.constant 0 : index
    %c0_7 = arith.constant 0 : index
    %c0_8 = arith.constant 0 : index
    %8 = vector.load %arg4[%c0_6, %c0_7, %c0_8] : memref<1x1x8xf32, #tpu.memory_space<vmem>>, vector<1x1x8xf32>
    %9 = vector.shape_cast %8 : vector<1x1x8xf32> to vector<1x8xf32>
    %10 = vector.broadcast %9 : vector<1x8xf32> to vector<8x8xf32>
    %11 = arith.addf %7, %10 : vector<8x8xf32>
    %c0_9 = arith.constant 0 : index
    %c0_10 = arith.constant 0 : index
    %c0_11 = arith.constant 0 : index
    %12 = vector.load %arg5[%c0_9, %c0_10, %c0_11] : memref<1x32x8xf32, #tpu.memory_space<vmem>>, vector<1x32x8xf32>
    %13 = vector.shape_cast %12 : vector<1x32x8xf32> to vector<32x8xf32>
    %cst_12 = arith.constant dense<0.000000e+00> : vector<8x8xf32>
    %14 = tpu.matmul %1, %13, %cst_12 {dimension_numbers = #tpu.dot_dimension_numbers<[1], [0], [0], [1], [0, 0, 1, 1], [], []>} : vector<8x32xf32>, vector<32x8xf32>, vector<8x8xf32> -> vector<8x8xf32>
    %c0_13 = arith.constant 0 : index
    %c0_14 = arith.constant 0 : index
    %c0_15 = arith.constant 0 : index
    %15 = vector.load %arg6[%c0_13, %c0_14, %c0_15] : memref<1x1x8xf32, #tpu.memory_space<vmem>>, vector<1x1x8xf32>
    %16 = vector.shape_cast %15 : vector<1x1x8xf32> to vector<1x8xf32>
    %17 = vector.broadcast %16 : vector<1x8xf32> to vector<8x8xf32>
    %18 = arith.addf %14, %17 : vector<8x8xf32>
    %c0_16 = arith.constant 0 : index
    %c0_17 = arith.constant 0 : index
    %c0_18 = arith.constant 0 : index
    %19 = vector.load %arg7[%c0_16, %c0_17, %c0_18] : memref<1x32x8xf32, #tpu.memory_space<vmem>>, vector<1x32x8xf32>
    %20 = vector.shape_cast %19 : vector<1x32x8xf32> to vector<32x8xf32>
    %cst_19 = arith.constant dense<0.000000e+00> : vector<8x8xf32>
    %21 = tpu.matmul %1, %20, %cst_19 {dimension_numbers = #tpu.dot_dimension_numbers<[1], [0], [0], [1], [0, 0, 1, 1], [], []>} : vector<8x32xf32>, vector<32x8xf32>, vector<8x8xf32> -> vector<8x8xf32>
    %c0_20 = arith.constant 0 : index
    %c0_21 = arith.constant 0 : index
    %c0_22 = arith.constant 0 : index
    %22 = vector.load %arg8[%c0_20, %c0_21, %c0_22] : memref<1x1x8xf32, #tpu.memory_space<vmem>>, vector<1x1x8xf32>
    %23 = vector.shape_cast %22 : vector<1x1x8xf32> to vector<1x8xf32>
    %24 = vector.broadcast %23 : vector<1x8xf32> to vector<8x8xf32>
    %25 = arith.addf %21, %24 : vector<8x8xf32>
    %cst_23 = arith.constant dense<0.000000e+00> : vector<8x8xf32>
    %26 = tpu.matmul %11, %18, %cst_23 {dimension_numbers = #tpu.dot_dimension_numbers<[1], [1], [0], [0], [0, 0, 1, 0], [], []>} : vector<8x8xf32>, vector<8x8xf32>, vector<8x8xf32> -> vector<8x8xf32>
    %cst_24 = arith.constant dense<0xFF800000> : vector<8xf32>
    %27 = vector.multi_reduction <maximumf>, %26, %cst_24 [1] : vector<8x8xf32> to vector<8xf32>
    %28 = vector.shape_cast %27 : vector<8xf32> to vector<8x1xf32>
    %29 = vector.broadcast %28 : vector<8x1xf32> to vector<8x8xf32>
    %30 = arith.subf %26, %29 : vector<8x8xf32>
    %31 = math.exp %30 : vector<8x8xf32>
    %cst_25 = arith.constant dense<0.000000e+00> : vector<8xf32>
    %32 = vector.multi_reduction <add>, %31, %cst_25 [1] : vector<8x8xf32> to vector<8xf32>
    %33 = vector.shape_cast %32 : vector<8xf32> to vector<8x1xf32>
    %34 = tpu.reciprocal %33 {approx = true} : vector<8x1xf32> -> vector<8x1xf32>
    %cst_26 = arith.constant 0.353553385 : f32
    %35 = vector.broadcast %cst_26 : f32 to vector<8x1xf32>
    %36 = arith.mulf %34, %35 : vector<8x1xf32>
    %37 = vector.broadcast %36 : vector<8x1xf32> to vector<8x8xf32>
    %38 = arith.mulf %31, %37 : vector<8x8xf32>
    %cst_27 = arith.constant dense<0.000000e+00> : vector<8x8xf32>
    %39 = tpu.matmul %38, %25, %cst_27 {dimension_numbers = #tpu.dot_dimension_numbers<[1], [0], [0], [1], [0, 0, 1, 1], [], []>} : vector<8x8xf32>, vector<8x8xf32>, vector<8x8xf32> -> vector<8x8xf32>
    %c0_28 = arith.constant 0 : index
    %c0_29 = arith.constant 0 : index
    %40 = vector.load %arg12[%c0_28, %c0_29] : memref<8x32xf32, #tpu.memory_space<vmem>>, vector<8x32xf32>
    %c0_30 = arith.constant 0 : index
    %c0_31 = arith.constant 0 : index
    %c0_32 = arith.constant 0 : index
    %41 = vector.load %arg9[%c0_30, %c0_31, %c0_32] : memref<1x8x32xf32, #tpu.memory_space<vmem>>, vector<1x8x32xf32>
    %42 = vector.shape_cast %41 : vector<1x8x32xf32> to vector<8x32xf32>
    %cst_33 = arith.constant dense<0.000000e+00> : vector<8x32xf32>
    %43 = tpu.matmul %39, %42, %cst_33 {dimension_numbers = #tpu.dot_dimension_numbers<[1], [0], [0], [1], [0, 0, 1, 1], [], []>} : vector<8x8xf32>, vector<8x32xf32>, vector<8x32xf32> -> vector<8x32xf32>
    %44 = arith.addf %40, %43 : vector<8x32xf32>
    %c0_34 = arith.constant 0 : index
    %c0_35 = arith.constant 0 : index
    %45 = vector.load %arg12[%c0_34, %c0_35] : memref<8x32xf32, #tpu.memory_space<vmem>>, vector<8x32xf32>
    tpu.vector_store %arg12[%c0_34, %c0_35], %44 {strides = array<i32>} : memref<8x32xf32, #tpu.memory_space<vmem>>, vector<8x32xf32>,
    %c3_i32 = arith.constant 3 : i32
    %46 = arith.cmpi eq, %arg1, %c3_i32 : i32
    %47 = arith.extui %46 : i1 to i32
    %c0_i32_36 = arith.constant 0 : i32
    %48 = arith.cmpi ne, %47, %c0_i32_36 : i32
    scf.if %48 {
      %c0_37 = arith.constant 0 : index
      %c0_38 = arith.constant 0 : index
      %49 = vector.load %arg12[%c0_37, %c0_38] : memref<8x32xf32, #tpu.memory_space<vmem>>, vector<8x32xf32>
      %c0_39 = arith.constant 0 : index
      %c0_40 = arith.constant 0 : index
      %50 = vector.load %arg10[%c0_39, %c0_40] : memref<1x32xf32, #tpu.memory_space<vmem>>, vector<1x32xf32>
      %51 = vector.broadcast %50 : vector<1x32xf32> to vector<8x32xf32>
      %52 = arith.addf %49, %51 : vector<8x32xf32>
      %c0_41 = arith.constant 0 : index
      %c0_42 = arith.constant 0 : index
      %c0_43 = arith.constant 0 : index
      %53 = vector.load %arg11[%c0_41, %c0_42, %c0_43] : memref<1x8x32xf32, #tpu.memory_space<vmem>>, vector<1x8x32xf32>
      %54 = vector.shape_cast %53 : vector<1x8x32xf32> to vector<8x32xf32>
      %55 = vector.shape_cast %52 : vector<8x32xf32> to vector<1x8x32xf32>
      tpu.vector_store %arg11[%c0_41, %c0_42, %c0_43], %55 {strides = array<i32>} : memref<1x8x32xf32, #tpu.memory_space<vmem>>, vector<1x8x32xf32>,
    } else {
    }
    return
  }
  func.func @transform_0(%arg0: i32, %arg1: i32) -> (i32, i32, i32) {
    %c0_i32 = arith.constant 0 : i32
    %c0_i32_0 = arith.constant 0 : i32
    %c0_i32_1 = arith.constant 0 : i32
    return %arg0, %c0_i32, %c0_i32_0 : i32, i32, i32
  }
  func.func @transform_1(%arg0: i32, %arg1: i32) -> (i32, i32, i32) {
    %c0_i32 = arith.constant 0 : i32
    %c0_i32_0 = arith.constant 0 : i32
    %c0_i32_1 = arith.constant 0 : i32
    return %arg1, %c0_i32, %c0_i32_0 : i32, i32, i32
  }
  func.func @transform_2(%arg0: i32, %arg1: i32) -> (i32, i32, i32) {
    %c0_i32 = arith.constant 0 : i32
    %c0_i32_0 = arith.constant 0 : i32
    %c0_i32_1 = arith.constant 0 : i32
    return %arg1, %c0_i32, %c0_i32_0 : i32, i32, i32
  }
  func.func @transform_3(%arg0: i32, %arg1: i32) -> (i32, i32, i32) {
    %c0_i32 = arith.constant 0 : i32
    %c0_i32_0 = arith.constant 0 : i32
    %c0_i32_1 = arith.constant 0 : i32
    return %arg1, %c0_i32, %c0_i32_0 : i32, i32, i32
  }
  func.func @transform_4(%arg0: i32, %arg1: i32) -> (i32, i32, i32) {
    %c0_i32 = arith.constant 0 : i32
    %c0_i32_0 = arith.constant 0 : i32
    %c0_i32_1 = arith.constant 0 : i32
    return %arg1, %c0_i32, %c0_i32_0 : i32, i32, i32
  }
  func.func @transform_5(%arg0: i32, %arg1: i32) -> (i32, i32, i32) {
    %c0_i32 = arith.constant 0 : i32
    %c0_i32_0 = arith.constant 0 : i32
    %c0_i32_1 = arith.constant 0 : i32
    return %arg1, %c0_i32, %c0_i32_0 : i32, i32, i32
  }
  func.func @transform_6(%arg0: i32, %arg1: i32) -> (i32, i32, i32) {
    %c0_i32 = arith.constant 0 : i32
    %c0_i32_0 = arith.constant 0 : i32
    %c0_i32_1 = arith.constant 0 : i32
    return %arg1, %c0_i32, %c0_i32_0 : i32, i32, i32
  }
  func.func @transform_7(%arg0: i32, %arg1: i32) -> (i32, i32, i32) {
    %c0_i32 = arith.constant 0 : i32
    %c0_i32_0 = arith.constant 0 : i32
    %c0_i32_1 = arith.constant 0 : i32
    return %arg1, %c0_i32, %c0_i32_0 : i32, i32, i32
  }
  func.func @transform_8(%arg0: i32, %arg1: i32) -> (i32, i32) {
    %c0_i32 = arith.constant 0 : i32
    %c0_i32_0 = arith.constant 0 : i32
    %c0_i32_1 = arith.constant 0 : i32
    return %c0_i32, %c0_i32_0 : i32, i32
  }
  func.func @transform_9(%arg0: i32, %arg1: i32) -> (i32, i32, i32) {
    %c0_i32 = arith.constant 0 : i32
    %c0_i32_0 = arith.constant 0 : i32
    %c0_i32_1 = arith.constant 0 : i32
    return %arg0, %c0_i32, %c0_i32_0 : i32, i32, i32
  }
}

</mosaic_0001>

<bundles_post_ra>
// kernel: tpu_custom_call.1
= control target key start
LH: loop header
LB: loop body
LE: loop exit
PB: predicated region body
PF: predicated region fallthrough
CT: control target
= control target key end

     0   :  { %s1700_s0 = inlined_call_operand.vmem [shape: f32[2,8,32], index: 0, kind: input, shape index: {}]   ;;  %s1701_s1 = inlined_call_operand.vmem [shape: f32[4,32,8], index: 1, kind: input, shape index: {}]   ;;  %s1702_s2 = inlined_call_operand.vmem [shape: f32[4,1,8], index: 2, kind: input, shape index: {}]   ;;  %s1703_s3 = inlined_call_operand.vmem [shape: f32[4,32,8], index: 3, kind: input, shape index: {}]   ;;  %s1704_s4 = inlined_call_operand.vmem [shape: f32[4,1,8], index: 4, kind: input, shape index: {}]   ;;  %s1705_s5 = inlined_call_operand.vmem [shape: f32[4,32,8], index: 5, kind: input, shape index: {}]   ;;  %s1706_s6 = inlined_call_operand.vmem [shape: f32[4,1,8], index: 6, kind: input, shape index: {}]   ;;  %s1707_s7 = inlined_call_operand.vmem [shape: f32[4,8,32], index: 7, kind: input, shape index: {}]   ;;  %s1708_s8 = inlined_call_operand.vmem [shape: f32[1,32], index: 8, kind: input, shape index: {}]   ;;  %s1709_s9 = inlined_call_operand.hbm [shape: f32[2,8,32], index: 9, kind: output, shape index: {}]  }
   0x1   :  { %1720 = sst [smem:[#allocation15_spill]] %s1700_s0 }
   0x2   :  { %1721 = sst [smem:[#allocation16_spill]] %s1701_s1 }
   0x3   :  { %1722 = sst [smem:[#allocation17_spill]] %s1709_s9 }
   0x4   :  { %14 = vsyncpa [#allocation4], 0 }
   0x5   :  { %16 = vsyncpa [#allocation4 + $0x1], 0  ;;  %s1476_s30 = smov 0   ;;  %s1478_s10 = smov 0  }
   0x6   :  { %s1480_s11 = smov 0   ;;  %s1482_s12 = smov 0  }
   0x7   :  { %s1484_s13 = smov 0   ;;  %s1486_s14 = smov 0  }
   0x8   :  { %s1488_s15 = smov 0   ;;  %s1490_s16 = smov 0  }
   0x9 LB: > { %1723 = sst [smem:[#allocation6_spill]] %s1391_s30  ;;  %s1125_s17 = sadd.s32 4294967295, %s1419_s16   ;;  %s1419_s16 = sphi %s1490_s16, %s22_s16   ;;  %s1415_s15 = sphi %s1488_s15, %s1748_s15   ;;  %s1411_s14 = sphi %s1486_s14, %s1747_s14   ;;  %s1407_s13 = sphi %s1484_s13, %s1746_s13   ;;  %s1403_s12 = sphi %s1482_s12, %s1745_s12   ;;  %s1399_s11 = sphi %s1480_s11, %s1744_s11   ;;  %s1395_s10 = sphi %s1478_s10, %s1750_s10   ;;  %s1391_s30 = sphi %s1476_s30, %s1749_s30  }
   0xa   : > { %1724 = sst [smem:[#allocation7_spill]] %s1399_s11  ;;  %s1126_s18 = sadd.s32 4294967294, %s1419_s16  }
   0xb   : > { %1725 = sst [smem:[#allocation8_spill]] %s1411_s14  ;;  %s31_s19 = sadd.s32 1, %s1411_s14 }
   0xc   : > { %1726 = sst [smem:[#allocation9_spill]] %s1415_s15  ;;  %p32_p0 = scmp.ge.s32.totalorder %s31_s19, 4 }
   0xd   : > { %1727 = sst [smem:[#allocation10_spill]] %s1419_s16  ;;  %s34_s20 = sadd.s32 1, %s1415_s15 }
   0xe   : > { %p280_p1 = scmp.ne.s32.totalorder %s1399_s11, %s1395_s10  ;;  %p281_p2 = scmp.eq.s32.totalorder %s1125_s17, 7 }
   0xf   : > { %s1752_s19 = smov (%p32_p0, %s31_s19), 0  ;;  %s1754_s20 = smov (!%p32_p0, %s34_s20), %s1415_s15 }
  0x10   : > { %1728 = sst [smem:[#allocation11_spill]] %s1752_s19  ;;  %p1525_p3 = por %p281_p2, %p280_p1 }
  0x11   : > { %p286_p4 = scmp.ne.s32.totalorder %s1395_s10, %s1391_s30  ;;  %p36_p5 = scmp.ge.s32.totalorder %s1754_s20, 2 }
  0x12   : > { %p287_p6 = scmp.eq.s32.totalorder %s1126_s18, 7  ;;  %p1129_p7 = scmp.ge.s32.totalorder %s1419_s16, 1 }
  0x13   : > { %p364_p8 = scmp.lt.s32.totalorder %s1419_s16, 9  ;;  %s1756_s20 = smov (%p36_p5, %s1754_s20), 0 }
  0x14   : > { %1730 = sst [smem:[#allocation12_spill]] %s1756_s20  ;;  %p1535_p9 = por %p287_p6, %p286_p4 }
  0x15   : > { %p365_p10 = pnand %p1129_p7, %p364_p8  ;;  %s267_s23 = ssub.s32 %s1415_s15, %s1756_s20 }
  0x16   : > { %s1731_s22 = scalar_select %p1535_p9, 1, 0 }
  0x17   : > { %s270_s24 = sadd.s32 1, %s1399_s11  ;;  %p268_p11 = scmp.eq.s32.totalorder %s267_s23, 0 }
  0x18   : > { %1732 = sst [smem:[#allocation13_spill]] %s1731_s22  ;;  %368 = sbr.rel (%p365_p10) target bundleno = 1259 (0x4eb), region = 56 }
  0x19   : > { %s1543_s25 = scalar_select %p268_p11, %s1399_s11, %s270_s24  }
  0x1a   : > { %s1712_s26 = sand.u32 (!%p365_p10), 1, %s1395_s10   ;;  %p427_p12 = scmp.lt.s32.totalorder (!%p365_p10), %s1407_s13, 1 }
  0x1b   : > { %1733 = sst [smem:[#allocation14_spill]] %s1543_s25  ;;  %s1549_s27 = sshll.u32 (!%p365_p10), %s1712_s26, 3 }
  0x1c   : > { %p431_p13 = scmp.lt.s32.totalorder (!%p365_p10), %s1403_s12, 3  ;;  %s1734_s0 = sld [smem:[#allocation15_spill]] (!%p365_p10) }
  0x1d   : > { %s1735_s1 = sld [smem:[#allocation16_spill]] (!%p365_p10)  ;;  %s426_s30 = scalar_lea.vmem (!%p365_p10), [#allocation3], %s1549_s27 }
  0x1e   : > { %p1139_p0 = scmp.ne.s32.totalorder (!%p365_p10), %s1403_s12, 0 }
  0x1f   : > { %s428_s28 = scalar_select %p427_p12, %s1407_s13, 1 }
  0x20   : > { %s1554_s29 = scalar_select %p431_p13, %s1403_s12, 3 }
  0x21   : > { %s1131_s17 = sshll.u32 %s428_s28, 3  ;;  %463 = sbr.rel (%p1139_p0) target bundleno = 40 (0x28), region = 60  ;;  %vm464_vm0 = vcmask (!%p1139_p0), 261120   ;;  %v1421_v1 = vmov (!%p1139_p0), 0.0  }
  0x22   : > { %s430_s24 = scalar_lea.vmem %s1734_s0, %s1131_s17  ;;  %s1156_s20 = sshll.u32 %s1554_s29, 5  ;;  %465 = vst.msk [vmem:[#allocation2] sm:$0xff] (!%p1139_p0), %vm464_vm0, %v1421_v1 }
  0x23   : > { %s1563_s26 = scalar_lea.vmem %s1735_s1, %s1156_s20  ;;  %v1569_v0 = vld [vmem:[%s430_s24] sm:$0xff]  ;;  %s443_s28 = scalar_lea.vmem %s1703_s3, %s1156_s20 }
  0x24   : > { %s446_s17 = scalar_lea.vmem %s1704_s4, %s1554_s29  ;;  %s1581_s15 = scalar_lea.vmem %s1705_s5, %s1156_s20 }
  0x25   : > { %s454_s14 = scalar_lea.vmem %s1706_s6, %s1554_s29  ;;  %s1138_s25 = sshll.u32 %s1554_s29, 3 }
  0x26   : > { %s1591_s1 = scalar_lea.vmem %s1707_s7, %s1138_s25 }
  0x28 PF: > { %v551_v2 = vld [vmem:[%s443_s28] sm:$0xff]  ;;  %v552_v3 = vld [vmem:[%s443_s28 + $0x8] sm:$0xff]  ;;  %v1422_v5 = vmov 0.0|0.0   ;;  %v553_v8 = vld [vmem:[%s443_s28 + $0x10] sm:$0xff]  ;;  %vm1423_vm1 = vmmov 0   ;;  %v1424_v11 = vmov 0.0   ;;  %s1736_s20 = scalar_lea.vmem %s1702_s2, %s1554_s29 }
  0x29   : > { %v466_v4 = vld [vmem:[%s1563_s26] sm:$0xff]  ;;  %1234 = vmatprep.subr.bf16.mxu1 %v1422_v5  ;;  %v1235_v6 = vpack.c.bf16 %v552_v3, %v551_v2  ;;  %1228 = vmatprep.subr.bf16.mxu0 %v1422_v5  ;;  %v467_v7 = vld [vmem:[%s1563_s26 + $0x8] sm:$0xff]  ;;  %v554_v9 = vld [vmem:[%s443_s28 + $0x18] sm:$0xff]  ;;  %vm477_vm2 = vcmask 261120   ;;  %vm713_vm3 = vcmask 64512   ;;  %p1150_p1 = scmp.ne.s32.totalorder %s1403_s12, 3 }
  0x2a   : > { %v1229_v10 = vpack.c.bf16 %v467_v7, %v466_v4  ;;  %1199 = vmatprep.mubr.msk.f32.mxu1 %vm1423_vm1, %v1424_v11  ;;  %v468_v12 = vld [vmem:[%s1563_s26 + $0x10] sm:$0xff]  ;;  %v469_v13 = vld [vmem:[%s1563_s26 + $0x18] sm:$0xff]  ;;  %1188 = vmatprep.mubr.msk.f32.mxu0 %vm1423_vm1, %v1424_v11  ;;  %v1238_v14 = vpack.c.bf16 %v554_v9, %v553_v8  ;;  %v1142_v16 = vld [vmem:[%s446_s17] ss:$0 sm:$0xff] }
  0x2b   : > { %1236 = vmatpush3.bf16.msra.mxu1 %v1235_v6  ;;  %v1232_v15 = vpack.c.bf16 %v469_v13, %v468_v12  ;;  %v1140_v17 = vld [vmem:[%s1736_s20] ss:$0 sm:$0xff]  ;;  %v633_v25 = vld [vmem:[%s1581_s15 + $0x8] sm:$0xff]  ;;  %v634_v26 = vld [vmem:[%s1581_s15 + $0x10] sm:$0xff] }
  0x2c   : > { %1230 = vmatpush3.bf16.msra.mxu0 %v1229_v10  ;;  %1237 = vmatprep.subr.bf16.mxu1 %v1422_v5  ;;  %v632_v24 = vld [vmem:[%s1581_s15] sm:$0xff]  ;;  %v635_v28 = vld [vmem:[%s1581_s15 + $0x18] sm:$0xff] }
  0x2d   : > { %1231 = vmatprep.subr.bf16.mxu0 %v1422_v5  ;;  %v1241_v27 = vpack.c.bf16 %v633_v25, %v632_v24  ;;  %v1244_v29 = vpack.c.bf16 %v635_v28, %v634_v26  ;;  %v1144_v39 = vld [vmem:[%s454_s14] ss:$0 sm:$0xff] }
  0x2e   : > { %v876_v42 = vld [vmem:[%s1591_s1] sm:$0xff] }
  0x2f   : > { %1239 = vmatpush3.bf16.msra.mxu1 %v1238_v14  ;;  %v875_v49 = vld [vmem:[#allocation2] sm:$0xff] }
  0x30   : > { %1233 = vmatpush3.bf16.msra.mxu0 %v1232_v15  ;;  %1213 = vmatprep.subr.mxu1 %v1424_v11  ;;  %v1151_v54 = vld [vmem:[%s1708_s8] ss:$0 sm:$0xff] (!%p1150_p1) }
  0x31   : > { %1240 = vmatprep.subr.bf16.mxu0 %v1422_v5 }
  0x32   : > { %1200 = vmatmul.mubr.msk.f32.vlgmr.msra.gmra.mrb[0].mxu1 %vm477_vm2, %v1569_v0 }
  0x33   : > { %1189 = vmatmul.mubr.msk.f32.vlgmr.msra.gmra.mrb[0].mxu0 %vm477_vm2, %v1569_v0  ;;  %1215 = vmatprep.mubr.msk.f32.mxu1 %vm1423_vm1, %v1424_v11 }
  0x34   : > { %1210 = vmatprep.mubr.msk.f32.mxu0 %vm1423_vm1, %v1424_v11  ;;  %1242 = vmatpush3.bf16.msra.mxu0 %v1241_v27 }
  0x35   : > { %1243 = vmatprep.subr.bf16.mxu0 %v1422_v5 }
  0x38   : > { %1245 = vmatpush3.bf16.msra.mxu0 %v1244_v29 }
  0x39   : > { %1223 = vmatprep.subr.mxu0 %v1424_v11 }
  0x3b   : > { %1211 = vmatmul.mubr.msk.f32.vlgmr.msra.gmra.mrb[2].mxu0 %vm477_vm2, %v1569_v0 }
  0x3c   : > { %1225 = vmatprep.mubr.msk.f32.mxu0 %vm1423_vm1, %v1424_v11  ;;  %1224 = vmatpush3.msra.mxu0 %v876_v42 }
 0x105   : > { %v628_v18 = vpop.f32.mrb[0].mxu1 }
 0x106   : > { %v629_v19 = vadd.f32 %v1142_v16, %v628_v18  ;;  %v1201_v20 = vpop.f32.mrb[1].mxu1  ;;  %v547_v21 = vpop.f32.mrb[0].mxu0 }
 0x107   : > { %v548_v22 = vadd.f32 %v1140_v17, %v547_v21  ;;  %v1190_v23 = vpop.f32.mrb[1].mxu0 }
 0x108   : > { %1214 = vmatpush3.xpose.msk.msra.mxu1 %vm713_vm3, %v629_v19 }
 0x109   : > { %1218 = vmatprep.subr.mxu1 %v1424_v11 }
 0x10b   : > { %1216 = vmatmul.mubr.msk.f32.vlgmr.msra.gmra.mrb[2].mxu1 %vm713_vm3, %v548_v22 }
 0x10c   : > { %1220 = vmatprep.mubr.msk.f32.mxu1 %vm1423_vm1, %v1424_v11 }
 0x10e   : > { %v709_v38 = vpop.f32.mrb[2].mxu0 }
 0x10f   : > { %v1212_v40 = vpop.f32.mrb[3].mxu0  ;;  %v710_v41 = vadd.f32 %v1144_v39, %v709_v38 }
 0x111   : > { %1219 = vmatpush3.msra.mxu1 %v710_v41 }
 0x1de   : > { %v786_v30 = vpop.f32.mrb[2].mxu1 }
 0x1df   : > { %v1217_v31 = vpop.f32.mrb[3].mxu1  ;;  %v790_v32 = vsel %vm713_vm3, %v786_v30, -inf }
 0x1e0   : > { %791 = vmax.xlane.f32.xlu0 %v790_v32 }
 0x26d   : > { %v792_v33 = vpop.xlane.xlu0 %791 }
 0x26e   : > { %v793_v34 = vsub.f32 %v786_v30, %v792_v33 }
 0x270   : > { %v794_v35 = vmul.f32 1.442695, %v793_v34 }
 0x272   : > { %1321 = vpow2.f32 %v794_v35 }
 0x27c   : > { %v1322_v36 = vpop.eup %1321 }
 0x27d   : > { %v796_v37 = vsel %vm713_vm3, %v1322_v36, 0.0 }
 0x27e   : > { %797 = vadd.xlane.f32.xlu0 %v796_v37 }
 0x30b   : > { %v798_v43 = vpop.xlane.xlu0 %797 }
 0x30c   : > { %1323 = vrcp.f32 %v798_v43 }
 0x316   : > { %v1324_v44 = vpop.eup %1323 }
 0x317   : > { %v800_v45 = vmul.f32 0.35355338, %v1324_v44 }
 0x319   : > { %v801_v46 = vmul.f32 %v1322_v36, %v800_v45 }
 0x31b   : > { %1221 = vmatmul.mubr.msk.f32.vlgmr.msra.gmra.mrb[4].mxu1 %vm713_vm3, %v801_v46 }
 0x3ee   : > { %v871_v47 = vpop.f32.mrb[4].mxu1 }
 0x3ef   : > { %v1222_v48 = vpop.f32.mrb[5].mxu1  ;;  %1226 = vmatmul.mubr.msk.f32.vlgmr.msra.gmra.mrb[4].mxu0 %vm713_vm3, %v871_v47 }
 0x4bf   : > { %955 = sbr.rel (%p1150_p1) target bundleno = 1232 (0x4d0), region = 64 }
 0x4c2   : > { %v946_v50 = vpop.f32.mrb[4].mxu0 }
 0x4c3   : > { %v950_v51 = vadd.f32 %v946_v50, %v875_v49  ;;  %v1227_v52 = vpop.f32.mrb[5].mxu0 }
 0x4c5   : > { %951 = vst.msk [vmem:[#allocation2] sm:$0xff] %vm477_vm2, %v950_v51 }
 0x4cc   : > { %v956_v53 = vld [vmem:[#allocation2] sm:$0xff] }
 0x4cd   : > { %v964_v55 = vadd.f32 %v1151_v54, %v956_v53 }
 0x4cf   : > { %965 = vst.msk [vmem:[%s426_s30] sm:$0xff] %vm477_vm2, %v964_v55 }
 0x4d0 PF: > { %s1153_s28 = sshll.u32 %s1407_s13, 7  ;;  %s1737_s12 = sld [smem:[#allocation17_spill]] }
 0x4d1   : > { %s980_s19 = sshll.u32 %s426_s30, 4  ;;  %s1739_s14 = sand.u32 1, %s1395_s10   ;;  %s981_s19 = int_to_ptr.vmem [resolvable:$true] %s980_s19 }
 0x4d2   : > { %s967_s25 = scalar_lea.sflag [#allocation4], %s1739_s14  ;;  %s1325_s24 = scalar_lea.vmem %s981_s19, 128 }
 0x4d3   : > { %p1326_p2 = scmp.ne.s32.totalorder %s981_s19, %s1325_s24  ;;  %s1425_s0 = smov [#allocation3]  }
 0x4d4   : > { %s1329_s9 = sshll.u32 %s1425_s0, 4  ;;  %s1330_s9 = int_to_ptr.vmem [resolvable:$false] %s1329_s9 }
 0x4d5   : > { %p1327_p4 = pnand %p1326_p2, %p1525_p3  ;;  %s1331_s11 = scalar_lea.vmem %s1330_s9, 256 }
 0x4d6   : > { %s1738_s23 = smov %s1737_s12  ;;  %s1649_s15 = scalar_lea.hbm %s1737_s12, %s1153_s28 }
 0x4d7   : > { %p1328_p5 = pneg %p1327_p4  ;;  %p1332_p6 = scmp.lt.s32.totalorder %s981_s19, %s1330_s9 }
 0x4d8   : > { %p1333_p7 = scmp.lt.s32.totalorder %s1331_s11, %s1325_s24 }
 0x4da   : > { %p1334_p8 = por %p1333_p7, %p1332_p6 }
 0x4dc   : > { %p1335_p10 = pnand %p1334_p8, %p1328_p5 }
 0x4de   : > { %1338 = shalt.err (!%p1335_p10)
}
 0x4df   : > { %s1339_s13 = scalar_lea.hbm %s1649_s15, 128  ;;  %s1343_s16 = scalar_lea.hbm %s1738_s23, 256 }
 0x4e0   : > { %p1340_p11 = scmp.ne.s32.totalorder %s1649_s15, %s1339_s13  ;;  %p1344_p0 = scmp.lt.u32.totalorder %s1649_s15, %s1738_s23 }
 0x4e1   : > { %p1345_p1 = scmp.lt.u32.totalorder %s1343_s16, %s1339_s13  ;;  %p1347_p4 = scmp.lt.u32.totalorder %s1339_s13, %s1649_s15 }
 0x4e2   : > { %p1341_p12 = pnand %p1340_p11, %p1525_p3 }
 0x4e3   : > { %p1346_p2 = por %p1345_p1, %p1344_p0 }
 0x4e4   : > { %p1342_p13 = pneg %p1341_p12 }
 0x4e5   : > { %p1348_p5 = por %p1347_p4, %p1346_p2 }
 0x4e7   : > { %p1349_p6 = pnand %p1348_p5, %p1342_p13 }
 0x4e9   : > { %1352 = shalt.err (!%p1349_p6)
}
 0x4ea   : > { %1246 = dma.vmem_to_hbm [thread:$0]  (%p1525_p3), %s981_s19, 128, %s1649_s15, %s967_s25  }
 0x4eb PF: > { %s1740_s26 = sld [smem:[#allocation10_spill]]  ;;  %s1741_s1 = sld [smem:[#allocation6_spill]] }
 0x4f1   : > { %p1252_p7 = scmp.ge.s32.totalorder %s1740_s26, 2  ;;  %s992_s28 = sand.u32 1, %s1741_s1  }
 0x4f2   : > { %s993_s17 = scalar_lea.sflag [#allocation4], %s992_s28 }
 0x4f3   : > { %p1249_p8 = pnand %p1252_p7, %p1535_p9 }
 0x4f5   : > { %1386 = dma.done.wait (!%p1249_p8), %s993_s17, 128  }
 0x4f6   : > { %1388 = vsyncadd (!%p1249_p8), %s993_s17, 4294967168  ;;  %s22_s16 = sadd.s32 1, %s1740_s26   ;;  %s1743_s18 = sld [smem:[#allocation7_spill]] }
 0x4f7   : > { %p19_p10 = scmp.ge.s32.totalorder %s22_s16, 10   ;;  %s1744_s11 = sld [smem:[#allocation14_spill]] }
 0x4f8   : > { %s1745_s12 = sld [smem:[#allocation8_spill]]  ;;  %s1746_s13 = sld [smem:[#allocation9_spill]] }
 0x4f9   : > { %s1747_s14 = sld [smem:[#allocation11_spill]]  ;;  %s1748_s15 = sld [smem:[#allocation12_spill]] }
 0x4fa   : > { %s1749_s30 = smov %s1395_s10  ;;  %21 = sbr.rel (!%p19_p10) target bundleno = 9 (0x9), region = 120 }
 0x4fc   : > { %s1750_s10 = smov %s1743_s18 }
 0x501   :  { %998 = vsyncpa [#allocation4], 1 }
 0x502   :  { %1000 = vsyncpa [#allocation4 + $0x1], 1 }

</bundles_post_ra>
